<compile_context>
chip_gen: v6e
topology: v6e:2x2x1
jax: 0.10.0
libtpu: 0.0.40
codegen_flags: <defaults>
</compile_context>

<pallas_src>
import math

import jax
import jax.numpy as jnp
from jax.experimental import pallas as pl
from jax.experimental.pallas import tpu as pltpu


def f1_kernel(x_ref, w0t_ref, b0_ref, w1t_ref, b1_ref, out_ref):
    # x_ref:   (tn, d)      batch tile (unpadded feature dim)
    # w0t_ref: (d, h_p)     first-layer weight, pre-transposed (resident)
    # b0_ref:  (1, h_p)     first-layer bias row
    # w1t_ref: (h_p, k)     second-layer weight, pre-transposed (resident)
    # b1_ref:  (1, k)       second-layer bias row
    # out_ref: (tn, k)      output tile (unpadded class dim)
    hidden = jnp.dot(x_ref[...], w0t_ref[...],
                     preferred_element_type=jnp.float32)
    hidden = jnp.maximum(hidden + b0_ref[...], 0.0)          # relu on f32 acc
    out = jnp.dot(hidden, w1t_ref[...],
                  preferred_element_type=jnp.float32)
    out_ref[...] = (out + b1_ref[...]).astype(out_ref.dtype)


def _round_up(v: int, m: int) -> int:
    return ((v + m - 1) // m) * m


def _num_tensorcores() -> int:
    """2 on dual-TensorCore chips (v7x), else 1 (v5e/v6e)."""
    try:
        kind = jax.devices()[0].device_kind.lower()
        if "v7" in kind:
            return 2
    except Exception:
        pass
    return 1


def prepare_f1_params(w0, b0, w1, b1):
    """One-time parameter prep: transpose + pad hidden dim, bias rows.

    Done at init time (NOT per forward call) so the per-call path is just the
    pallas_call.
    """
    h, d = w0.shape
    k = w1.shape[0]
    h_p = _round_up(h, 128)        # exact: extra hidden cols stay 0 thru relu
    f32 = jnp.float32
    w0t = jnp.zeros((d, h_p), f32).at[:, :h].set(w0.T.astype(f32))
    w1t = jnp.zeros((h_p, k), f32).at[:h, :].set(w1.astype(f32).T)
    b0_row = jnp.zeros((1, h_p), f32).at[0, :h].set(b0.astype(f32))
    b1_row = b1.astype(f32).reshape(1, k)
    return w0t, b0_row, w1t, b1_row


def f1_forward(x, w0t, b0_row, w1t, b1_row):
    """out = relu(x @ W0^T + b0) @ W1^T + b1  == (W1 @ relu(W0 @ x^T + b0) + b1)^T"""
    n, d = x.shape
    h_p = w0t.shape[1]
    k = w1t.shape[1]

    # One block per TensorCore: grid=(1,) on v5e/v6e, grid=(2,) on v7x.
    n_blocks = _num_tensorcores()
    tn = _round_up(max(1, (n + n_blocks - 1) // n_blocks), 8)
    n_p = _round_up(n, tn)
    grid_n = n_p // tn

    x = x.astype(jnp.float32)
    if n_p != n:
        x = jnp.pad(x, ((0, n_p - n), (0, 0)))

    h = h_p  # upper bound; true h only changes the estimate marginally
    flops = 2 * n * (d * h + h * k)
    bytes_accessed = 4 * (n * d + d * h + h * k + n * k + h + k)

    out_p = pl.pallas_call(
        f1_kernel,
        out_shape=jax.ShapeDtypeStruct((n_p, k), jnp.float32),
        grid=(grid_n,),
        in_specs=[
            pl.BlockSpec((tn, d), lambda i: (i, 0)),      # x tile (unpadded d)
            pl.BlockSpec((d, h_p), lambda i: (0, 0)),     # W0^T (resident)
            pl.BlockSpec((1, h_p), lambda i: (0, 0)),     # b0 row
            pl.BlockSpec((h_p, k), lambda i: (0, 0)),     # W1^T (resident)
            pl.BlockSpec((1, k), lambda i: (0, 0)),       # b1 row
        ],
        out_specs=pl.BlockSpec((tn, k), lambda i: (i, 0)),
        compiler_params=pltpu.CompilerParams(
            dimension_semantics=("parallel",),
        ),
        cost_estimate=pl.CostEstimate(
            flops=flops, transcendentals=0, bytes_accessed=bytes_accessed),
    )(x, w0t, b0_row, w1t, b1_row)

    return out_p if n_p == n else out_p[:n]


if __name__ == "__main__":
    # Small shapes consistent with the module's forward: x (n, d) -> out (n, k).
    n, d, h, k = 512, 32, 64, 16

    key = jax.random.PRNGKey(0)
    kx, kw0, kb0, kw1, kb1 = jax.random.split(key, 5)

    # Deterministic init mirroring F1.__init__: U(-1/sqrt(d), 1/sqrt(d)) for
    # layer 0, U(-1/sqrt(h), 1/sqrt(h)) for layer 1.
    alpha0 = 1.0 / math.sqrt(d)
    alpha1 = 1.0 / math.sqrt(h)
    x = jax.random.normal(kx, (n, d), dtype=jnp.float32)
    w0 = jax.random.uniform(kw0, (h, d), minval=-alpha0, maxval=alpha0,
                            dtype=jnp.float32)
    b0 = jax.random.uniform(kb0, (h,), minval=-alpha0, maxval=alpha0,
                            dtype=jnp.float32)
    w1 = jax.random.uniform(kw1, (k, h), minval=-alpha1, maxval=alpha1,
                            dtype=jnp.float32)
    b1 = jax.random.uniform(kb1, (k,), minval=-alpha1, maxval=alpha1,
                            dtype=jnp.float32)

    # One-time parameter prep (hoisted out of the per-call path).
    params = prepare_f1_params(w0, b0, w1, b1)
    params = jax.tree_util.tree_map(jax.block_until_ready, params)

    fwd = jax.jit(f1_forward)
    out = fwd(x, *params)
    out = jax.block_until_ready(out)

    # Pure-JAX reference of the exact PyTorch forward semantics.
    ref = (jnp.dot(w1, jnp.maximum(jnp.dot(w0, x.T) + b0[:, None], 0.0))
           + b1[:, None]).T
    assert out.shape == (n, k)
    assert jnp.allclose(out, ref, atol=1e-5, rtol=1e-5)

    print("KERNEL_OK")
</pallas_src>

<mosaic_0001>
module attributes {stable_mosaic.version = 11 : i64} {
  func.func @f1_kernel(%arg0: i32, %arg1: memref<512x32xf32, #tpu.memory_space<vmem>>, %arg2: memref<32x128xf32, #tpu.memory_space<vmem>>, %arg3: memref<1x128xf32, #tpu.memory_space<vmem>>, %arg4: memref<128x16xf32, #tpu.memory_space<vmem>>, %arg5: memref<1x16xf32, #tpu.memory_space<vmem>>, %arg6: memref<512x16xf32, #tpu.memory_space<vmem>>) attributes {dimension_semantics = [#tpu.dimension_semantics<parallel>], iteration_bounds = array<i64: 1>, scalar_prefetch = 0 : i64, scratch_operands = 0 : i64, tpu.core_type = #tpu.core_type<tc>, window_params = [{transform_indices = @transform_0, window_bounds = array<i64: 512, 32>}, {pipeline_mode = #tpu.pipeline_mode<synchronous>, transform_indices = @transform_1, window_bounds = array<i64: 32, 128>}, {pipeline_mode = #tpu.pipeline_mode<synchronous>, transform_indices = @transform_2, window_bounds = array<i64: 1, 128>}, {pipeline_mode = #tpu.pipeline_mode<synchronous>, transform_indices = @transform_3, window_bounds = array<i64: 128, 16>}, {pipeline_mode = #tpu.pipeline_mode<synchronous>, transform_indices = @transform_4, window_bounds = array<i64: 1, 16>}, {transform_indices = @transform_5, window_bounds = array<i64: 512, 16>}]} {
    %c0 = arith.constant 0 : index
    %c0_0 = arith.constant 0 : index
    %0 = vector.load %arg1[%c0, %c0_0] : memref<512x32xf32, #tpu.memory_space<vmem>>, vector<512x32xf32>
    %c0_1 = arith.constant 0 : index
    %c0_2 = arith.constant 0 : index
    %1 = vector.load %arg2[%c0_1, %c0_2] : memref<32x128xf32, #tpu.memory_space<vmem>>, vector<32x128xf32>
    %cst = arith.constant dense<0.000000e+00> : vector<512x128xf32>
    %2 = tpu.matmul %0, %1, %cst {dimension_numbers = #tpu.dot_dimension_numbers<[1], [0], [0], [1], [0, 0, 1, 1], [], []>} : vector<512x32xf32>, vector<32x128xf32>, vector<512x128xf32> -> vector<512x128xf32>
    %c0_3 = arith.constant 0 : index
    %c0_4 = arith.constant 0 : index
    %3 = vector.load %arg3[%c0_3, %c0_4] : memref<1x128xf32, #tpu.memory_space<vmem>>, vector<1x128xf32>
    %4 = vector.broadcast %3 : vector<1x128xf32> to vector<512x128xf32>
    %5 = arith.addf %2, %4 : vector<512x128xf32>
    %cst_5 = arith.constant 0.000000e+00 : f32
    %6 = vector.broadcast %cst_5 : f32 to vector<512x128xf32>
    %7 = arith.maximumf %5, %6 : vector<512x128xf32>
    %c0_6 = arith.constant 0 : index
    %c0_7 = arith.constant 0 : index
    %8 = vector.load %arg4[%c0_6, %c0_7] : memref<128x16xf32, #tpu.memory_space<vmem>>, vector<128x16xf32>
    %cst_8 = arith.constant dense<0.000000e+00> : vector<512x16xf32>
    %9 = tpu.matmul %7, %8, %cst_8 {dimension_numbers = #tpu.dot_dimension_numbers<[1], [0], [0], [1], [0, 0, 1, 1], [], []>} : vector<512x128xf32>, vector<128x16xf32>, vector<512x16xf32> -> vector<512x16xf32>
    %c0_9 = arith.constant 0 : index
    %c0_10 = arith.constant 0 : index
    %10 = vector.load %arg5[%c0_9, %c0_10] : memref<1x16xf32, #tpu.memory_space<vmem>>, vector<1x16xf32>
    %11 = vector.broadcast %10 : vector<1x16xf32> to vector<512x16xf32>
    %12 = arith.addf %9, %11 : vector<512x16xf32>
    %c0_11 = arith.constant 0 : index
    %c0_12 = arith.constant 0 : index
    %13 = vector.load %arg6[%c0_11, %c0_12] : memref<512x16xf32, #tpu.memory_space<vmem>>, vector<512x16xf32>
    tpu.vector_store %arg6[%c0_11, %c0_12], %12 {strides = array<i32>} : memref<512x16xf32, #tpu.memory_space<vmem>>, vector<512x16xf32>,
    return
  }
  func.func @transform_0(%arg0: i32) -> (i32, i32) {
    %c0_i32 = arith.constant 0 : i32
    %c0_i32_0 = arith.constant 0 : i32
    return %arg0, %c0_i32 : i32, i32
  }
  func.func @transform_1(%arg0: i32) -> (i32, i32) {
    %c0_i32 = arith.constant 0 : i32
    %c0_i32_0 = arith.constant 0 : i32
    %c0_i32_1 = arith.constant 0 : i32
    return %c0_i32, %c0_i32_0 : i32, i32
  }
  func.func @transform_2(%arg0: i32) -> (i32, i32) {
    %c0_i32 = arith.constant 0 : i32
    %c0_i32_0 = arith.constant 0 : i32
    %c0_i32_1 = arith.constant 0 : i32
    return %c0_i32, %c0_i32_0 : i32, i32
  }
  func.func @transform_3(%arg0: i32) -> (i32, i32) {
    %c0_i32 = arith.constant 0 : i32
    %c0_i32_0 = arith.constant 0 : i32
    %c0_i32_1 = arith.constant 0 : i32
    return %c0_i32, %c0_i32_0 : i32, i32
  }
  func.func @transform_4(%arg0: i32) -> (i32, i32) {
    %c0_i32 = arith.constant 0 : i32
    %c0_i32_0 = arith.constant 0 : i32
    %c0_i32_1 = arith.constant 0 : i32
    return %c0_i32, %c0_i32_0 : i32, i32
  }
  func.func @transform_5(%arg0: i32) -> (i32, i32) {
    %c0_i32 = arith.constant 0 : i32
    %c0_i32_0 = arith.constant 0 : i32
    return %arg0, %c0_i32 : i32, i32
  }
}

</mosaic_0001>

<bundles_post_ra>
// kernel: f1_forward.1
= control target key start
LH: loop header
LB: loop body
LE: loop exit
PB: predicated region body
PF: predicated region fallthrough
CT: control target
= control target key end

     0   :  { %vm95_vm0 = vcmask 261120   ;;  %vm1145_vm1 = vcmask 130048   ;;  %s2432_s1 = inlined_call_operand.vmem [shape: f32[32,128], index: 1, kind: input, shape index: {}]   ;;  %s2433_s0 = inlined_call_operand.vmem [shape: f32[512,32], index: 0, kind: input, shape index: {}]   ;;  %s2434_s3 = inlined_call_operand.vmem [shape: f32[128,16], index: 3, kind: input, shape index: {}]   ;;  %s2435_s2 = inlined_call_operand.vmem [shape: f32[1,128], index: 2, kind: input, shape index: {}]   ;;  %s2436_s4 = inlined_call_operand.vmem [shape: f32[1,16], index: 4, kind: input, shape index: {}]   ;;  %s2437_s5 = inlined_call_operand.vmem [shape: f32[512,16], index: 5, kind: output, shape index: {}]  }
   0x1   :  { %v87_v0 = vld [vmem:[%s2432_s1 + $0x18] sm:$0xff]  ;;  %v86_v1 = vld [vmem:[%s2432_s1 + $0x10] sm:$0xff]  ;;  %v20_v2 = vld [vmem:[%s2433_s0] sm:$0xff] }
   0x2   :  { %1428 = vmatprep.subr.mxu0 %v87_v0  ;;  %v85_v3 = vld [vmem:[%s2432_s1 + $0x8] sm:$0xff]  ;;  %1436 = vmatprep.mubr.msk.f32.mxu0 %vm95_vm0, %v20_v2  ;;  %v84_v4 = vld [vmem:[%s2432_s1] sm:$0xff]  ;;  %v22_v6 = vld [vmem:[%s2433_s0 + $0x10] sm:$0xff] }
   0x3   :  { %1429 = vmatpush3.msra.mxu0 %v87_v0  ;;  %v21_v5 = vld [vmem:[%s2433_s0 + $0x8] sm:$0xff]  ;;  %v23_v7 = vld [vmem:[%s2433_s0 + $0x18] sm:$0xff]  ;;  %v24_v8 = vld [vmem:[%s2433_s0 + $0x20] sm:$0xff] }
   0x4   :  { %1430 = vmatprep.subr.mxu0 %v86_v1  ;;  %v25_v9 = vld [vmem:[%s2433_s0 + $0x28] sm:$0xff]  ;;  %v26_v10 = vld [vmem:[%s2433_s0 + $0x30] sm:$0xff]  ;;  %v27_v11 = vld [vmem:[%s2433_s0 + $0x38] sm:$0xff] }
   0x5   :  { %1431 = vmatpush3.msra.mxu0 %v86_v1  ;;  %v28_v12 = vld [vmem:[%s2433_s0 + $0x40] sm:$0xff]  ;;  %v29_v13 = vld [vmem:[%s2433_s0 + $0x48] sm:$0xff]  ;;  %v752_v14 = vld [vmem:[%s2434_s3 + $0x78] sm:$0xff] }
   0x6   :  { %1432 = vmatprep.subr.mxu0 %v85_v3  ;;  %v30_v15 = vld [vmem:[%s2433_s0 + $0x50] sm:$0xff]  ;;  %1660 = vmatprep.subr.mxu1 %v752_v14  ;;  %v750_v17 = vld [vmem:[%s2434_s3 + $0x68] sm:$0xff]  ;;  %v31_v18 = vld [vmem:[%s2433_s0 + $0x58] sm:$0xff] }
   0x7   :  { %1433 = vmatpush3.msra.mxu0 %v85_v3  ;;  %v751_v16 = vld [vmem:[%s2434_s3 + $0x70] sm:$0xff]  ;;  %1676 = vmatpush3.msra.mxu1 %v752_v14  ;;  %v749_v19 = vld [vmem:[%s2434_s3 + $0x60] sm:$0xff]  ;;  %v748_v21 = vld [vmem:[%s2434_s3 + $0x58] sm:$0xff] }
   0x8   :  { %1434 = vmatprep.subr.mxu0 %v84_v4  ;;  %v32_v20 = vld [vmem:[%s2433_s0 + $0x60] sm:$0xff]  ;;  %1661 = vmatprep.subr.mxu1 %v751_v16  ;;  %v33_v22 = vld [vmem:[%s2433_s0 + $0x68] sm:$0xff]  ;;  %v747_v23 = vld [vmem:[%s2434_s3 + $0x50] sm:$0xff] }
   0x9   :  { %1435 = vmatpush3.msra.mxu0 %v84_v4  ;;  %1677 = vmatpush3.msra.mxu1 %v751_v16  ;;  %v34_v24 = vld [vmem:[%s2433_s0 + $0x70] sm:$0xff]  ;;  %v746_v25 = vld [vmem:[%s2434_s3 + $0x48] sm:$0xff]  ;;  %v35_v26 = vld [vmem:[%s2433_s0 + $0x78] sm:$0xff] }
   0xa   :  { %1437 = vmatmul.mubr.msk.f32.vlgmr.msra.gmra.mxu0 %vm95_vm0, %v21_v5  ;;  %1532 = vmatprep.subr.mxu0 %v752_v14  ;;  %v745_v27 = vld [vmem:[%s2434_s3 + $0x40] sm:$0xff]  ;;  %v744_v29 = vld [vmem:[%s2434_s3 + $0x38] sm:$0xff]  ;;  %v37_v30 = vld [vmem:[%s2433_s0 + $0x88] sm:$0xff] }
   0xb   :  { %1439 = vmatprep.mubr.msk.f32.mxu0 %vm95_vm0, %v22_v6  ;;  %1533 = vmatpush3.msra.mxu0 %v752_v14  ;;  %v36_v28 = vld [vmem:[%s2433_s0 + $0x80] sm:$0xff]  ;;  %v743_v31 = vld [vmem:[%s2434_s3 + $0x30] sm:$0xff]  ;;  %v742_v33 = vld [vmem:[%s2434_s3 + $0x28] sm:$0xff] }
   0xc   :  { %1534 = vmatprep.subr.mxu0 %v751_v16  ;;  %1662 = vmatprep.subr.mxu1 %v750_v17  ;;  %v38_v32 = vld [vmem:[%s2433_s0 + $0x90] sm:$0xff]  ;;  %v39_v34 = vld [vmem:[%s2433_s0 + $0x98] sm:$0xff]  ;;  %v741_v35 = vld [vmem:[%s2434_s3 + $0x20] sm:$0xff] }
   0xd   :  { %1535 = vmatpush3.msra.mxu0 %v751_v16  ;;  %1678 = vmatpush3.msra.mxu1 %v750_v17  ;;  %v40_v36 = vld [vmem:[%s2433_s0 + $0xa0] sm:$0xff]  ;;  %v41_v37 = vld [vmem:[%s2433_s0 + $0xa8] sm:$0xff]  ;;  %v42_v38 = vld [vmem:[%s2433_s0 + $0xb0] sm:$0xff] }
   0xe   :  { %1440 = vmatmul.mubr.msk.f32.gmra.mxu0 %vm95_vm0, %v23_v7  ;;  %1536 = vmatprep.subr.mxu0 %v750_v17  ;;  %v43_v39 = vld [vmem:[%s2433_s0 + $0xb8] sm:$0xff]  ;;  %v44_v40 = vld [vmem:[%s2433_s0 + $0xc0] sm:$0xff]  ;;  %v45_v41 = vld [vmem:[%s2433_s0 + $0xc8] sm:$0xff] }
   0xf   :  { %1442 = vmatprep.mubr.msk.f32.mxu0 %vm95_vm0, %v24_v8  ;;  %1537 = vmatpush3.msra.mxu0 %v750_v17  ;;  %v46_v42 = vld [vmem:[%s2433_s0 + $0xd0] sm:$0xff]  ;;  %v47_v43 = vld [vmem:[%s2433_s0 + $0xd8] sm:$0xff]  ;;  %v48_v44 = vld [vmem:[%s2433_s0 + $0xe0] sm:$0xff] }
  0x10   :  { %1538 = vmatprep.subr.mxu0 %v749_v19  ;;  %1663 = vmatprep.subr.mxu1 %v749_v19  ;;  %v49_v45 = vld [vmem:[%s2433_s0 + $0xe8] sm:$0xff]  ;;  %v50_v46 = vld [vmem:[%s2433_s0 + $0xf0] sm:$0xff]  ;;  %v51_v47 = vld [vmem:[%s2433_s0 + $0xf8] sm:$0xff] }
  0x11   :  { %1539 = vmatpush3.msra.mxu0 %v749_v19  ;;  %1679 = vmatpush3.msra.mxu1 %v749_v19  ;;  %v52_v48 = vld [vmem:[%s2433_s0 + $0x100] sm:$0xff]  ;;  %v53_v49 = vld [vmem:[%s2433_s0 + $0x108] sm:$0xff]  ;;  %v54_v50 = vld [vmem:[%s2433_s0 + $0x110] sm:$0xff] }
  0x12   :  { %1443 = vmatmul.mubr.msk.f32.gmra.mxu0 %vm95_vm0, %v25_v9  ;;  %1540 = vmatprep.subr.mxu0 %v748_v21  ;;  %v740_v51 = vld [vmem:[%s2434_s3 + $0x18] sm:$0xff]  ;;  %v739_v53 = vld [vmem:[%s2434_s3 + $0x10] sm:$0xff]  ;;  %v56_v54 = vld [vmem:[%s2433_s0 + $0x120] sm:$0xff] }
  0x13   :  { %1445 = vmatprep.mubr.msk.f32.mxu0 %vm95_vm0, %v26_v10  ;;  %1541 = vmatpush3.msra.mxu0 %v748_v21  ;;  %v55_v52 = vld [vmem:[%s2433_s0 + $0x118] sm:$0xff]  ;;  %v738_v55 = vld [vmem:[%s2434_s3 + $0x8] sm:$0xff]  ;;  %v737_v57 = vld [vmem:[%s2434_s3] sm:$0xff] }
  0x14   :  { %1542 = vmatprep.subr.mxu0 %v747_v23  ;;  %1664 = vmatprep.subr.mxu1 %v748_v21  ;;  %v57_v56 = vld [vmem:[%s2433_s0 + $0x128] sm:$0xff]  ;;  %v58_v58 = vld [vmem:[%s2433_s0 + $0x130] sm:$0xff]  ;;  %v59_v59 = vld [vmem:[%s2433_s0 + $0x138] sm:$0xff] }
  0x15   :  { %1543 = vmatpush3.msra.mxu0 %v747_v23  ;;  %1680 = vmatpush3.msra.mxu1 %v748_v21  ;;  %v60_v60 = vld [vmem:[%s2433_s0 + $0x140] sm:$0xff]  ;;  %v61_v61 = vld [vmem:[%s2433_s0 + $0x148] sm:$0xff]  ;;  %v62_v62 = vld [vmem:[%s2433_s0 + $0x150] sm:$0xff] }
  0x16   :  { %1446 = vmatmul.mubr.msk.f32.gmra.mxu0 %vm95_vm0, %v27_v11  ;;  %1544 = vmatprep.subr.mxu0 %v746_v25  ;;  %v63_v63 = vld [vmem:[%s2433_s0 + $0x158] sm:$0xff]  ;;  %v64_v0 = vld [vmem:[%s2433_s0 + $0x160] sm:$0xff]  ;;  %v65_v1 = vld [vmem:[%s2433_s0 + $0x168] sm:$0xff] }
  0x17   :  { %1448 = vmatprep.mubr.msk.f32.mxu0 %vm95_vm0, %v28_v12  ;;  %1545 = vmatpush3.msra.mxu0 %v746_v25  ;;  %v66_v2 = vld [vmem:[%s2433_s0 + $0x170] sm:$0xff]  ;;  %v67_v3 = vld [vmem:[%s2433_s0 + $0x178] sm:$0xff]  ;;  %v68_v4 = vld [vmem:[%s2433_s0 + $0x180] sm:$0xff] }
  0x18   :  { %1546 = vmatprep.subr.mxu0 %v745_v27  ;;  %1665 = vmatprep.subr.mxu1 %v747_v23  ;;  %v69_v5 = vld [vmem:[%s2433_s0 + $0x188] sm:$0xff]  ;;  %v70_v6 = vld [vmem:[%s2433_s0 + $0x190] sm:$0xff]  ;;  %v71_v7 = vld [vmem:[%s2433_s0 + $0x198] sm:$0xff] }
  0x19   :  { %1547 = vmatpush3.msra.mxu0 %v745_v27  ;;  %1681 = vmatpush3.msra.mxu1 %v747_v23  ;;  %v72_v8 = vld [vmem:[%s2433_s0 + $0x1a0] sm:$0xff]  ;;  %v73_v9 = vld [vmem:[%s2433_s0 + $0x1a8] sm:$0xff]  ;;  %v74_v10 = vld [vmem:[%s2433_s0 + $0x1b0] sm:$0xff] }
  0x1a   :  { %1449 = vmatmul.mubr.msk.f32.gmra.mxu0 %vm95_vm0, %v29_v13  ;;  %1548 = vmatprep.subr.mxu0 %v744_v29  ;;  %v75_v11 = vld [vmem:[%s2433_s0 + $0x1b8] sm:$0xff]  ;;  %v76_v12 = vld [vmem:[%s2433_s0 + $0x1c0] sm:$0xff]  ;;  %v77_v13 = vld [vmem:[%s2433_s0 + $0x1c8] sm:$0xff] }
  0x1b   :  { %1451 = vmatprep.mubr.msk.f32.mxu0 %vm95_vm0, %v30_v15  ;;  %1549 = vmatpush3.msra.mxu0 %v744_v29  ;;  %v78_v14 = vld [vmem:[%s2433_s0 + $0x1d0] sm:$0xff]  ;;  %v79_v15 = vld [vmem:[%s2433_s0 + $0x1d8] sm:$0xff]  ;;  %v80_v16 = vld [vmem:[%s2433_s0 + $0x1e0] sm:$0xff] }
  0x1c   :  { %1550 = vmatprep.subr.mxu0 %v743_v31  ;;  %1666 = vmatprep.subr.mxu1 %v746_v25  ;;  %v81_v17 = vld [vmem:[%s2433_s0 + $0x1e8] sm:$0xff]  ;;  %v83_v19 = vld [vmem:[%s2433_s0 + $0x1f8] sm:$0xff] }
  0x1d   :  { %1551 = vmatpush3.msra.mxu0 %v743_v31  ;;  %1682 = vmatpush3.msra.mxu1 %v746_v25 }
  0x1e   :  { %1452 = vmatmul.mubr.msk.f32.gmra.mxu0 %vm95_vm0, %v31_v18  ;;  %1552 = vmatprep.subr.mxu0 %v742_v33  ;;  %v82_v18 = vld [vmem:[%s2433_s0 + $0x1f0] sm:$0xff] }
  0x1f   :  { %1454 = vmatprep.mubr.msk.f32.mxu0 %vm95_vm0, %v32_v20  ;;  %1553 = vmatpush3.msra.mxu0 %v742_v33  ;;  %v2041_v20 = vld [vmem:[%s2435_s2] ss:$0 sm:$0xff] }
  0x20   :  { %1554 = vmatprep.subr.mxu0 %v741_v35  ;;  %1667 = vmatprep.subr.mxu1 %v745_v27 }
  0x21   :  { %1555 = vmatpush3.msra.mxu0 %v741_v35  ;;  %1683 = vmatpush3.msra.mxu1 %v745_v27 }
  0x22   :  { %1455 = vmatmul.mubr.msk.f32.gmra.mxu0 %vm95_vm0, %v33_v22  ;;  %1668 = vmatprep.subr.mxu1 %v744_v29 }
  0x23   :  { %1457 = vmatprep.mubr.msk.f32.mxu0 %vm95_vm0, %v34_v24  ;;  %1684 = vmatpush3.msra.mxu1 %v744_v29 }
  0x24   :  { %1669 = vmatprep.subr.mxu1 %v743_v31  ;;  %1556 = vmatprep.subr.mxu0 %v740_v51 }
  0x25   :  { %1685 = vmatpush3.msra.mxu1 %v743_v31  ;;  %1557 = vmatpush3.msra.mxu0 %v740_v51 }
  0x26   :  { %1458 = vmatmul.mubr.msk.f32.gmra.mxu0 %vm95_vm0, %v35_v26  ;;  %1670 = vmatprep.subr.mxu1 %v742_v33 }
  0x27   :  { %1460 = vmatprep.mubr.msk.f32.mxu0 %vm95_vm0, %v36_v28  ;;  %1686 = vmatpush3.msra.mxu1 %v742_v33 }
  0x28   :  { %1671 = vmatprep.subr.mxu1 %v741_v35  ;;  %1558 = vmatprep.subr.mxu0 %v739_v53 }
  0x29   :  { %1687 = vmatpush3.msra.mxu1 %v741_v35  ;;  %1559 = vmatpush3.msra.mxu0 %v739_v53 }
  0x2a   :  { %1461 = vmatmul.mubr.msk.f32.gmra.mxu0 %vm95_vm0, %v37_v30  ;;  %1672 = vmatprep.subr.mxu1 %v740_v51 }
  0x2b   :  { %1463 = vmatprep.mubr.msk.f32.mxu0 %vm95_vm0, %v38_v32  ;;  %1688 = vmatpush3.msra.mxu1 %v740_v51 }
  0x2c   :  { %1560 = vmatprep.subr.mxu0 %v738_v55  ;;  %1673 = vmatprep.subr.mxu1 %v739_v53 }
  0x2d   :  { %1561 = vmatpush3.msra.mxu0 %v738_v55  ;;  %1689 = vmatpush3.msra.mxu1 %v739_v53 }
  0x2e   :  { %1464 = vmatmul.mubr.msk.f32.gmra.mxu0 %vm95_vm0, %v39_v34  ;;  %1562 = vmatprep.subr.mxu0 %v737_v57 }
  0x2f   :  { %1466 = vmatprep.mubr.msk.f32.mxu0 %vm95_vm0, %v40_v36  ;;  %1563 = vmatpush3.msra.mxu0 %v737_v57 }
  0x30   :  { %1674 = vmatprep.subr.mxu1 %v738_v55 }
  0x31   :  { %1690 = vmatpush3.msra.mxu1 %v738_v55 }
  0x32   :  { %1467 = vmatmul.mubr.msk.f32.gmra.mxu0 %vm95_vm0, %v41_v37  ;;  %1675 = vmatprep.subr.mxu1 %v737_v57 }
  0x33   :  { %1469 = vmatprep.mubr.msk.f32.mxu0 %vm95_vm0, %v42_v38  ;;  %1691 = vmatpush3.msra.mxu1 %v737_v57 }
  0x36   :  { %1470 = vmatmul.mubr.msk.f32.gmra.mxu0 %vm95_vm0, %v43_v39 }
  0x37   :  { %1472 = vmatprep.mubr.msk.f32.mxu0 %vm95_vm0, %v44_v40 }
  0x3a   :  { %1473 = vmatmul.mubr.msk.f32.gmra.mxu0 %vm95_vm0, %v45_v41 }
  0x3b   :  { %1475 = vmatprep.mubr.msk.f32.mxu0 %vm95_vm0, %v46_v42 }
  0x3e   :  { %1476 = vmatmul.mubr.msk.f32.gmra.mxu0 %vm95_vm0, %v47_v43 }
  0x3f   :  { %1478 = vmatprep.mubr.msk.f32.mxu0 %vm95_vm0, %v48_v44 }
  0x42   :  { %1479 = vmatmul.mubr.msk.f32.gmra.mxu0 %vm95_vm0, %v49_v45 }
  0x43   :  { %1481 = vmatprep.mubr.msk.f32.mxu0 %vm95_vm0, %v50_v46 }
  0x46   :  { %1482 = vmatmul.mubr.msk.f32.gmra.mxu0 %vm95_vm0, %v51_v47 }
  0x47   :  { %1484 = vmatprep.mubr.msk.f32.mxu0 %vm95_vm0, %v52_v48 }
  0x4a   :  { %1485 = vmatmul.mubr.msk.f32.gmra.mxu0 %vm95_vm0, %v53_v49 }
  0x4b   :  { %1487 = vmatprep.mubr.msk.f32.mxu0 %vm95_vm0, %v54_v50 }
  0x4e   :  { %1488 = vmatmul.mubr.msk.f32.gmra.mxu0 %vm95_vm0, %v55_v52 }
  0x4f   :  { %1490 = vmatprep.mubr.msk.f32.mxu0 %vm95_vm0, %v56_v54 }
  0x52   :  { %1491 = vmatmul.mubr.msk.f32.gmra.mxu0 %vm95_vm0, %v57_v56 }
  0x53   :  { %1493 = vmatprep.mubr.msk.f32.mxu0 %vm95_vm0, %v58_v58 }
  0x56   :  { %1494 = vmatmul.mubr.msk.f32.gmra.mxu0 %vm95_vm0, %v59_v59 }
  0x57   :  { %1496 = vmatprep.mubr.msk.f32.mxu0 %vm95_vm0, %v60_v60 }
  0x5a   :  { %1497 = vmatmul.mubr.msk.f32.gmra.mxu0 %vm95_vm0, %v61_v61 }
  0x5b   :  { %1499 = vmatprep.mubr.msk.f32.mxu0 %vm95_vm0, %v62_v62 }
  0x5e   :  { %1500 = vmatmul.mubr.msk.f32.gmra.mxu0 %vm95_vm0, %v63_v63 }
  0x5f   :  { %1502 = vmatprep.mubr.msk.f32.mxu0 %vm95_vm0, %v64_v0 }
  0x62   :  { %1503 = vmatmul.mubr.msk.f32.gmra.mxu0 %vm95_vm0, %v65_v1 }
  0x63   :  { %1505 = vmatprep.mubr.msk.f32.mxu0 %vm95_vm0, %v66_v2 }
  0x66   :  { %1506 = vmatmul.mubr.msk.f32.gmra.mxu0 %vm95_vm0, %v67_v3 }
  0x67   :  { %1508 = vmatprep.mubr.msk.f32.mxu0 %vm95_vm0, %v68_v4 }
  0x6a   :  { %1509 = vmatmul.mubr.msk.f32.gmra.mxu0 %vm95_vm0, %v69_v5 }
  0x6b   :  { %1511 = vmatprep.mubr.msk.f32.mxu0 %vm95_vm0, %v70_v6 }
  0x6e   :  { %1512 = vmatmul.mubr.msk.f32.gmra.mxu0 %vm95_vm0, %v71_v7 }
  0x6f   :  { %1514 = vmatprep.mubr.msk.f32.mxu0 %vm95_vm0, %v72_v8 }
  0x72   :  { %1515 = vmatmul.mubr.msk.f32.gmra.mxu0 %vm95_vm0, %v73_v9 }
  0x73   :  { %1517 = vmatprep.mubr.msk.f32.mxu0 %vm95_vm0, %v74_v10 }
  0x76   :  { %1518 = vmatmul.mubr.msk.f32.gmra.mxu0 %vm95_vm0, %v75_v11 }
  0x77   :  { %1520 = vmatprep.mubr.msk.f32.mxu0 %vm95_vm0, %v76_v12 }
  0x7a   :  { %1521 = vmatmul.mubr.msk.f32.gmra.mxu0 %vm95_vm0, %v77_v13 }
  0x7b   :  { %1523 = vmatprep.mubr.msk.f32.mxu0 %vm95_vm0, %v78_v14 }
  0x7e   :  { %1524 = vmatmul.mubr.msk.f32.gmra.mxu0 %vm95_vm0, %v79_v15 }
  0x7f   :  { %1526 = vmatprep.mubr.msk.f32.mxu0 %vm95_vm0, %v80_v16 }
  0x82   :  { %1527 = vmatmul.mubr.msk.f32.gmra.mxu0 %vm95_vm0, %v81_v17 }
  0x83   :  { %1529 = vmatprep.mubr.msk.f32.mxu0 %vm95_vm0, %v82_v18 }
  0x86   :  { %1530 = vmatmul.mubr.msk.f32.gmra.mxu0 %vm95_vm0, %v83_v19 }
  0xca   :  { %v1438_v21 = vpop.f32.mrf.mxu0 }
  0xcb   :  { %v360_v22 = vadd.f32 %v1438_v21, %v2041_v20 }
  0xcc   :  { %v354_v23 = vpop.f32.mrf.mxu0 }
  0xcd   :  { %v355_v24 = vadd.f32 %v2041_v20, %v354_v23  ;;  %v674_v27 = vmax.f32 %v360_v22, 0.0 }
  0xce   :  { %v1441_v25 = vpop.f32.mrf.mxu0 }
  0xcf   :  { %v673_v26 = vmax.f32 %v355_v24, 0.0  ;;  %v370_v28 = vadd.f32 %v1441_v25, %v2041_v20 }
  0xd0   :  { %v364_v29 = vpop.f32.mrf.mxu0 }
  0xd1   :  { %v365_v30 = vadd.f32 %v2041_v20, %v364_v29  ;;  %1564 = vmatprep.mubr.f32.mxu0 %v673_v26  ;;  %v676_v33 = vmax.f32 %v370_v28, 0.0 }
  0xd2   :  { %v1444_v31 = vpop.f32.mrf.mxu0  ;;  %1565 = vmatmul.mubr.f32.vlgmr.msra.gmra.mxu0 %v674_v27 }
  0xd3   :  { %v675_v32 = vmax.f32 %v365_v30, 0.0  ;;  %v380_v34 = vadd.f32 %v1444_v31, %v2041_v20 }
  0xd4   :  { %v374_v35 = vpop.f32.mrf.mxu0 }
  0xd5   :  { %v375_v36 = vadd.f32 %v2041_v20, %v374_v35  ;;  %1567 = vmatprep.mubr.f32.mxu0 %v675_v32  ;;  %v678_v39 = vmax.f32 %v380_v34, 0.0 }
  0xd6   :  { %v1447_v37 = vpop.f32.mrf.mxu0  ;;  %1568 = vmatmul.mubr.f32.gmra.mxu0 %v676_v33 }
  0xd7   :  { %v677_v38 = vmax.f32 %v375_v36, 0.0  ;;  %v390_v40 = vadd.f32 %v1447_v37, %v2041_v20 }
  0xd8   :  { %v384_v41 = vpop.f32.mrf.mxu0 }
  0xd9   :  { %1570 = vmatprep.mubr.f32.mxu0 %v677_v38  ;;  %v385_v42 = vadd.f32 %v2041_v20, %v384_v41  ;;  %v680_v45 = vmax.f32 %v390_v40, 0.0 }
  0xda   :  { %v1450_v43 = vpop.f32.mrf.mxu0  ;;  %1571 = vmatmul.mubr.f32.gmra.mxu0 %v678_v39 }
  0xdb   :  { %v679_v44 = vmax.f32 %v385_v42, 0.0  ;;  %v400_v46 = vadd.f32 %v1450_v43, %v2041_v20 }
  0xdc   :  { %v394_v47 = vpop.f32.mrf.mxu0 }
  0xdd   :  { %v395_v48 = vadd.f32 %v2041_v20, %v394_v47  ;;  %1573 = vmatprep.mubr.f32.mxu1 %v679_v44  ;;  %v682_v51 = vmax.f32 %v400_v46, 0.0 }
  0xde   :  { %v1453_v49 = vpop.f32.mrf.mxu0  ;;  %1574 = vmatmul.mubr.f32.vlgmr.msra.gmra.mxu1 %v680_v45 }
  0xdf   :  { %v681_v50 = vmax.f32 %v395_v48, 0.0  ;;  %v410_v52 = vadd.f32 %v1453_v49, %v2041_v20 }
  0xe0   :  { %v404_v53 = vpop.f32.mrf.mxu0 }
  0xe1   :  { %v405_v54 = vadd.f32 %v2041_v20, %v404_v53  ;;  %1576 = vmatprep.mubr.f32.mxu1 %v681_v50  ;;  %v684_v57 = vmax.f32 %v410_v52, 0.0 }
  0xe2   :  { %v1456_v55 = vpop.f32.mrf.mxu0  ;;  %1577 = vmatmul.mubr.f32.gmra.mxu1 %v682_v51 }
  0xe3   :  { %v683_v56 = vmax.f32 %v405_v54, 0.0  ;;  %v420_v58 = vadd.f32 %v1456_v55, %v2041_v20 }
  0xe4   :  { %v414_v59 = vpop.f32.mrf.mxu0 }
  0xe5   :  { %v415_v60 = vadd.f32 %v2041_v20, %v414_v59  ;;  %1579 = vmatprep.mubr.f32.mxu1 %v683_v56  ;;  %v686_v63 = vmax.f32 %v420_v58, 0.0 }
  0xe6   :  { %v1459_v61 = vpop.f32.mrf.mxu0  ;;  %1580 = vmatmul.mubr.f32.gmra.mxu1 %v684_v57 }
  0xe7   :  { %v685_v62 = vmax.f32 %v415_v60, 0.0  ;;  %v430_v0 = vadd.f32 %v1459_v61, %v2041_v20 }
  0xe8   :  { %v424_v1 = vpop.f32.mrf.mxu0 }
  0xe9   :  { %v425_v2 = vadd.f32 %v2041_v20, %v424_v1  ;;  %1582 = vmatprep.mubr.f32.mxu1 %v685_v62  ;;  %v688_v5 = vmax.f32 %v430_v0, 0.0 }
  0xea   :  { %v1462_v3 = vpop.f32.mrf.mxu0  ;;  %1583 = vmatmul.mubr.f32.gmra.mxu1 %v686_v63 }
  0xeb   :  { %v687_v4 = vmax.f32 %v425_v2, 0.0  ;;  %v440_v6 = vadd.f32 %v1462_v3, %v2041_v20 }
  0xec   :  { %v434_v7 = vpop.f32.mrf.mxu0 }
  0xed   :  { %v435_v8 = vadd.f32 %v2041_v20, %v434_v7  ;;  %1585 = vmatprep.mubr.f32.mxu1 %v687_v4  ;;  %v690_v11 = vmax.f32 %v440_v6, 0.0 }
  0xee   :  { %v1465_v9 = vpop.f32.mrf.mxu0  ;;  %1586 = vmatmul.mubr.f32.gmra.mxu1 %v688_v5 }
  0xef   :  { %v689_v10 = vmax.f32 %v435_v8, 0.0  ;;  %v450_v12 = vadd.f32 %v1465_v9, %v2041_v20 }
  0xf0   :  { %v444_v13 = vpop.f32.mrf.mxu0 }
  0xf1   :  { %v445_v14 = vadd.f32 %v2041_v20, %v444_v13  ;;  %1588 = vmatprep.mubr.f32.mxu1 %v689_v10  ;;  %v692_v17 = vmax.f32 %v450_v12, 0.0 }
  0xf2   :  { %v1468_v15 = vpop.f32.mrf.mxu0  ;;  %1589 = vmatmul.mubr.f32.gmra.mxu1 %v690_v11 }
  0xf3   :  { %v691_v16 = vmax.f32 %v445_v14, 0.0  ;;  %v460_v18 = vadd.f32 %v1468_v15, %v2041_v20 }
  0xf4   :  { %v454_v19 = vpop.f32.mrf.mxu0 }
  0xf5   :  { %v455_v21 = vadd.f32 %v2041_v20, %v454_v19  ;;  %1591 = vmatprep.mubr.f32.mxu1 %v691_v16  ;;  %v694_v24 = vmax.f32 %v460_v18, 0.0 }
  0xf6   :  { %v1471_v22 = vpop.f32.mrf.mxu0  ;;  %1592 = vmatmul.mubr.f32.gmra.mxu1 %v692_v17 }
  0xf7   :  { %v693_v23 = vmax.f32 %v455_v21, 0.0  ;;  %v470_v25 = vadd.f32 %v1471_v22, %v2041_v20 }
  0xf8   :  { %v464_v26 = vpop.f32.mrf.mxu0 }
  0xf9   :  { %v465_v27 = vadd.f32 %v2041_v20, %v464_v26  ;;  %1594 = vmatprep.mubr.f32.mxu1 %v693_v23  ;;  %v696_v30 = vmax.f32 %v470_v25, 0.0 }
  0xfa   :  { %v1474_v28 = vpop.f32.mrf.mxu0  ;;  %1595 = vmatmul.mubr.f32.gmra.mxu1 %v694_v24 }
  0xfb   :  { %v695_v29 = vmax.f32 %v465_v27, 0.0  ;;  %v480_v31 = vadd.f32 %v1474_v28, %v2041_v20 }
  0xfc   :  { %v474_v32 = vpop.f32.mrf.mxu0 }
  0xfd   :  { %v475_v33 = vadd.f32 %v2041_v20, %v474_v32  ;;  %1597 = vmatprep.mubr.f32.mxu1 %v695_v29  ;;  %v698_v36 = vmax.f32 %v480_v31, 0.0 }
  0xfe   :  { %v1477_v34 = vpop.f32.mrf.mxu0  ;;  %1598 = vmatmul.mubr.f32.gmra.mxu1 %v696_v30 }
  0xff   :  { %v697_v35 = vmax.f32 %v475_v33, 0.0  ;;  %v490_v37 = vadd.f32 %v1477_v34, %v2041_v20 }
 0x100   :  { %v484_v38 = vpop.f32.mrf.mxu0 }
 0x101   :  { %v485_v39 = vadd.f32 %v2041_v20, %v484_v38  ;;  %1600 = vmatprep.mubr.f32.mxu1 %v697_v35  ;;  %v700_v42 = vmax.f32 %v490_v37, 0.0 }
 0x102   :  { %v1480_v40 = vpop.f32.mrf.mxu0  ;;  %1601 = vmatmul.mubr.f32.gmra.mxu1 %v698_v36 }
 0x103   :  { %v699_v41 = vmax.f32 %v485_v39, 0.0  ;;  %v500_v43 = vadd.f32 %v1480_v40, %v2041_v20 }
 0x104   :  { %v494_v44 = vpop.f32.mrf.mxu0 }
 0x105   :  { %v495_v45 = vadd.f32 %v2041_v20, %v494_v44  ;;  %1603 = vmatprep.mubr.f32.mxu1 %v699_v41  ;;  %v702_v48 = vmax.f32 %v500_v43, 0.0 }
 0x106   :  { %v1483_v46 = vpop.f32.mrf.mxu0  ;;  %1604 = vmatmul.mubr.f32.gmra.mxu1 %v700_v42 }
 0x107   :  { %v701_v47 = vmax.f32 %v495_v45, 0.0  ;;  %v510_v49 = vadd.f32 %v1483_v46, %v2041_v20 }
 0x108   :  { %v504_v50 = vpop.f32.mrf.mxu0 }
 0x109   :  { %v505_v51 = vadd.f32 %v2041_v20, %v504_v50  ;;  %1606 = vmatprep.mubr.f32.mxu1 %v701_v47  ;;  %v704_v54 = vmax.f32 %v510_v49, 0.0 }
 0x10a   :  { %v1486_v52 = vpop.f32.mrf.mxu0  ;;  %1607 = vmatmul.mubr.f32.gmra.mxu1 %v702_v48 }
 0x10b   :  { %v703_v53 = vmax.f32 %v505_v51, 0.0  ;;  %v520_v55 = vadd.f32 %v1486_v52, %v2041_v20 }
 0x10c   :  { %v514_v56 = vpop.f32.mrf.mxu0 }
 0x10d   :  { %v515_v57 = vadd.f32 %v2041_v20, %v514_v56  ;;  %1609 = vmatprep.mubr.f32.mxu1 %v703_v53  ;;  %v706_v60 = vmax.f32 %v520_v55, 0.0 }
 0x10e   :  { %v1489_v58 = vpop.f32.mrf.mxu0  ;;  %1610 = vmatmul.mubr.f32.gmra.mxu1 %v704_v54 }
 0x10f   :  { %v705_v59 = vmax.f32 %v515_v57, 0.0  ;;  %v530_v61 = vadd.f32 %v1489_v58, %v2041_v20 }
 0x110   :  { %v524_v62 = vpop.f32.mrf.mxu0 }
 0x111   :  { %v525_v63 = vadd.f32 %v2041_v20, %v524_v62  ;;  %1612 = vmatprep.mubr.f32.mxu1 %v705_v59  ;;  %v708_v2 = vmax.f32 %v530_v61, 0.0 }
 0x112   :  { %v1492_v0 = vpop.f32.mrf.mxu0  ;;  %1613 = vmatmul.mubr.f32.gmra.mxu1 %v706_v60 }
 0x113   :  { %v707_v1 = vmax.f32 %v525_v63, 0.0  ;;  %v540_v3 = vadd.f32 %v1492_v0, %v2041_v20 }
 0x114   :  { %v534_v4 = vpop.f32.mrf.mxu0 }
 0x115   :  { %v535_v5 = vadd.f32 %v2041_v20, %v534_v4  ;;  %1615 = vmatprep.mubr.f32.mxu1 %v707_v1  ;;  %v710_v8 = vmax.f32 %v540_v3, 0.0 }
 0x116   :  { %v1495_v6 = vpop.f32.mrf.mxu0  ;;  %1616 = vmatmul.mubr.f32.gmra.mxu1 %v708_v2 }
 0x117   :  { %v709_v7 = vmax.f32 %v535_v5, 0.0  ;;  %v550_v9 = vadd.f32 %v1495_v6, %v2041_v20 }
 0x118   :  { %v544_v10 = vpop.f32.mrf.mxu0 }
 0x119   :  { %v545_v11 = vadd.f32 %v2041_v20, %v544_v10  ;;  %1618 = vmatprep.mubr.f32.mxu1 %v709_v7  ;;  %v712_v14 = vmax.f32 %v550_v9, 0.0 }
 0x11a   :  { %v1498_v12 = vpop.f32.mrf.mxu0  ;;  %1619 = vmatmul.mubr.f32.gmra.mxu1 %v710_v8 }
 0x11b   :  { %v711_v13 = vmax.f32 %v545_v11, 0.0  ;;  %v560_v15 = vadd.f32 %v1498_v12, %v2041_v20 }
 0x11c   :  { %v554_v16 = vpop.f32.mrf.mxu0 }
 0x11d   :  { %v555_v17 = vadd.f32 %v2041_v20, %v554_v16  ;;  %1621 = vmatprep.mubr.f32.mxu1 %v711_v13  ;;  %v714_v21 = vmax.f32 %v560_v15, 0.0 }
 0x11e   :  { %v1501_v18 = vpop.f32.mrf.mxu0  ;;  %1622 = vmatmul.mubr.f32.gmra.mxu1 %v712_v14 }
 0x11f   :  { %v713_v19 = vmax.f32 %v555_v17, 0.0  ;;  %v570_v22 = vadd.f32 %v1501_v18, %v2041_v20 }
 0x120   :  { %v564_v23 = vpop.f32.mrf.mxu0 }
 0x121   :  { %v565_v24 = vadd.f32 %v2041_v20, %v564_v23  ;;  %1624 = vmatprep.mubr.f32.mxu1 %v713_v19  ;;  %v716_v27 = vmax.f32 %v570_v22, 0.0 }
 0x122   :  { %v1504_v25 = vpop.f32.mrf.mxu0  ;;  %1625 = vmatmul.mubr.f32.gmra.mxu1 %v714_v21 }
 0x123   :  { %v715_v26 = vmax.f32 %v565_v24, 0.0  ;;  %v580_v28 = vadd.f32 %v1504_v25, %v2041_v20  ;;  %v2110_v24 = vld [vmem:[%s2436_s4] ss:$0 sm:$0xff] }
 0x124   :  { %v574_v29 = vpop.f32.mrf.mxu0 }
 0x125   :  { %v575_v30 = vadd.f32 %v2041_v20, %v574_v29  ;;  %1627 = vmatprep.mubr.f32.mxu1 %v715_v26  ;;  %v718_v33 = vmax.f32 %v580_v28, 0.0 }
 0x126   :  { %v1507_v31 = vpop.f32.mrf.mxu0  ;;  %1628 = vmatmul.mubr.f32.gmra.mxu1 %v716_v27 }
 0x127   :  { %v717_v32 = vmax.f32 %v575_v30, 0.0  ;;  %v590_v34 = vadd.f32 %v1507_v31, %v2041_v20 }
 0x128   :  { %v584_v35 = vpop.f32.mrf.mxu0 }
 0x129   :  { %v585_v36 = vadd.f32 %v2041_v20, %v584_v35  ;;  %1630 = vmatprep.mubr.f32.mxu1 %v717_v32  ;;  %v720_v39 = vmax.f32 %v590_v34, 0.0 }
 0x12a   :  { %v1510_v37 = vpop.f32.mrf.mxu0  ;;  %1631 = vmatmul.mubr.f32.gmra.mxu1 %v718_v33 }
 0x12b   :  { %v719_v38 = vmax.f32 %v585_v36, 0.0  ;;  %v600_v40 = vadd.f32 %v1510_v37, %v2041_v20 }
 0x12c   :  { %v594_v41 = vpop.f32.mrf.mxu0 }
 0x12d   :  { %v595_v42 = vadd.f32 %v2041_v20, %v594_v41  ;;  %1633 = vmatprep.mubr.f32.mxu1 %v719_v38  ;;  %v722_v45 = vmax.f32 %v600_v40, 0.0 }
 0x12e   :  { %v1513_v43 = vpop.f32.mrf.mxu0  ;;  %1634 = vmatmul.mubr.f32.gmra.mxu1 %v720_v39 }
 0x12f   :  { %v721_v44 = vmax.f32 %v595_v42, 0.0  ;;  %v610_v46 = vadd.f32 %v1513_v43, %v2041_v20 }
 0x130   :  { %v604_v47 = vpop.f32.mrf.mxu0 }
 0x131   :  { %v605_v48 = vadd.f32 %v2041_v20, %v604_v47  ;;  %1636 = vmatprep.mubr.f32.mxu1 %v721_v44  ;;  %v724_v51 = vmax.f32 %v610_v46, 0.0 }
 0x132   :  { %v1516_v49 = vpop.f32.mrf.mxu0  ;;  %1637 = vmatmul.mubr.f32.gmra.mxu1 %v722_v45 }
 0x133   :  { %v723_v50 = vmax.f32 %v605_v48, 0.0  ;;  %v620_v52 = vadd.f32 %v1516_v49, %v2041_v20 }
 0x134   :  { %v614_v53 = vpop.f32.mrf.mxu0 }
 0x135   :  { %v615_v54 = vadd.f32 %v2041_v20, %v614_v53  ;;  %1639 = vmatprep.mubr.f32.mxu1 %v723_v50  ;;  %v726_v57 = vmax.f32 %v620_v52, 0.0 }
 0x136   :  { %v1519_v55 = vpop.f32.mrf.mxu0  ;;  %1640 = vmatmul.mubr.f32.gmra.mxu1 %v724_v51 }
 0x137   :  { %v725_v56 = vmax.f32 %v615_v54, 0.0  ;;  %v630_v58 = vadd.f32 %v1519_v55, %v2041_v20 }
 0x138   :  { %v624_v59 = vpop.f32.mrf.mxu0 }
 0x139   :  { %v625_v60 = vadd.f32 %v2041_v20, %v624_v59  ;;  %1642 = vmatprep.mubr.f32.mxu1 %v725_v56  ;;  %v728_v63 = vmax.f32 %v630_v58, 0.0 }
 0x13a   :  { %v1522_v61 = vpop.f32.mrf.mxu0  ;;  %1643 = vmatmul.mubr.f32.gmra.mxu1 %v726_v57 }
 0x13b   :  { %v727_v62 = vmax.f32 %v625_v60, 0.0  ;;  %v640_v0 = vadd.f32 %v1522_v61, %v2041_v20 }
 0x13c   :  { %v634_v1 = vpop.f32.mrf.mxu0 }
 0x13d   :  { %v635_v2 = vadd.f32 %v2041_v20, %v634_v1  ;;  %1645 = vmatprep.mubr.f32.mxu1 %v727_v62  ;;  %v730_v5 = vmax.f32 %v640_v0, 0.0 }
 0x13e   :  { %v1525_v3 = vpop.f32.mrf.mxu0  ;;  %1646 = vmatmul.mubr.f32.gmra.mxu1 %v728_v63 }
 0x13f   :  { %v729_v4 = vmax.f32 %v635_v2, 0.0  ;;  %v650_v6 = vadd.f32 %v1525_v3, %v2041_v20 }
 0x140   :  { %v644_v7 = vpop.f32.mrf.mxu0 }
 0x141   :  { %v645_v8 = vadd.f32 %v2041_v20, %v644_v7  ;;  %1648 = vmatprep.mubr.f32.mxu1 %v729_v4  ;;  %v732_v11 = vmax.f32 %v650_v6, 0.0 }
 0x142   :  { %v1528_v9 = vpop.f32.mrf.mxu0  ;;  %1649 = vmatmul.mubr.f32.gmra.mxu1 %v730_v5 }
 0x143   :  { %v731_v10 = vmax.f32 %v645_v8, 0.0  ;;  %v660_v12 = vadd.f32 %v1528_v9, %v2041_v20 }
 0x144   :  { %v654_v13 = vpop.f32.mrf.mxu0 }
 0x145   :  { %v655_v14 = vadd.f32 %v2041_v20, %v654_v13  ;;  %1651 = vmatprep.mubr.f32.mxu1 %v731_v10  ;;  %v734_v17 = vmax.f32 %v660_v12, 0.0 }
 0x146   :  { %v1531_v15 = vpop.f32.mrf.mxu0  ;;  %1652 = vmatmul.mubr.f32.gmra.mxu1 %v732_v11 }
 0x147   :  { %v733_v16 = vmax.f32 %v655_v14, 0.0  ;;  %v670_v18 = vadd.f32 %v1531_v15, %v2041_v20 }
 0x148   :  { %v664_v19 = vpop.f32.mrf.mxu0 }
 0x149   :  { %v665_v21 = vadd.f32 %v2041_v20, %v664_v19  ;;  %1654 = vmatprep.mubr.f32.mxu1 %v733_v16  ;;  %v736_v23 = vmax.f32 %v670_v18, 0.0 }
 0x14a   :  { %1655 = vmatmul.mubr.f32.gmra.mxu1 %v734_v17 }
 0x14b   :  { %v735_v22 = vmax.f32 %v665_v21, 0.0 }
 0x14d   :  { %1657 = vmatprep.mubr.f32.mxu1 %v735_v22 }
 0x14e   :  { %1658 = vmatmul.mubr.f32.gmra.mxu1 %v736_v23 }
 0x192   :  { %v1566_v25 = vpop.f32.mrf.mxu0 }
 0x193   :  { %v832_v26 = vadd.f32 %v1566_v25, %v2110_v24 }
 0x194   :  { %v826_v27 = vpop.f32.mrf.mxu0 }
 0x195   :  { %1147 = vst.msk [vmem:[%s2437_s5 + $0x8] sm:$0xff] %vm1145_vm1, %v832_v26  ;;  %v827_v20 = vadd.f32 %v2110_v24, %v826_v27 }
 0x196   :  { %v1569_v28 = vpop.f32.mrf.mxu0 }
 0x197   :  { %1146 = vst.msk [vmem:[%s2437_s5] sm:$0xff] %vm1145_vm1, %v827_v20  ;;  %v842_v29 = vadd.f32 %v1569_v28, %v2110_v24 }
 0x198   :  { %v836_v30 = vpop.f32.mrf.mxu0 }
 0x199   :  { %1149 = vst.msk [vmem:[%s2437_s5 + $0x18] sm:$0xff] %vm1145_vm1, %v842_v29  ;;  %v837_v31 = vadd.f32 %v2110_v24, %v836_v30 }
 0x19a   :  { %v1572_v32 = vpop.f32.mrf.mxu0 }
 0x19b   :  { %1148 = vst.msk [vmem:[%s2437_s5 + $0x10] sm:$0xff] %vm1145_vm1, %v837_v31  ;;  %v852_v33 = vadd.f32 %v1572_v32, %v2110_v24 }
 0x19c   :  { %v846_v34 = vpop.f32.mrf.mxu0 }
 0x19d   :  { %1151 = vst.msk [vmem:[%s2437_s5 + $0x28] sm:$0xff] %vm1145_vm1, %v852_v33  ;;  %v847_v35 = vadd.f32 %v2110_v24, %v846_v34 }
 0x19e   :  { %v1575_v36 = vpop.f32.mrf.mxu1 }
 0x19f   :  { %1150 = vst.msk [vmem:[%s2437_s5 + $0x20] sm:$0xff] %vm1145_vm1, %v847_v35  ;;  %v862_v37 = vadd.f32 %v1575_v36, %v2110_v24 }
 0x1a0   :  { %v856_v38 = vpop.f32.mrf.mxu1 }
 0x1a1   :  { %1153 = vst.msk [vmem:[%s2437_s5 + $0x38] sm:$0xff] %vm1145_vm1, %v862_v37  ;;  %v857_v39 = vadd.f32 %v2110_v24, %v856_v38 }
 0x1a2   :  { %v1578_v40 = vpop.f32.mrf.mxu1 }
 0x1a3   :  { %1152 = vst.msk [vmem:[%s2437_s5 + $0x30] sm:$0xff] %vm1145_vm1, %v857_v39  ;;  %v872_v41 = vadd.f32 %v1578_v40, %v2110_v24 }
 0x1a4   :  { %v866_v42 = vpop.f32.mrf.mxu1 }
 0x1a5   :  { %1155 = vst.msk [vmem:[%s2437_s5 + $0x48] sm:$0xff] %vm1145_vm1, %v872_v41  ;;  %v867_v43 = vadd.f32 %v2110_v24, %v866_v42 }
 0x1a6   :  { %v1581_v44 = vpop.f32.mrf.mxu1 }
 0x1a7   :  { %1154 = vst.msk [vmem:[%s2437_s5 + $0x40] sm:$0xff] %vm1145_vm1, %v867_v43  ;;  %v882_v45 = vadd.f32 %v1581_v44, %v2110_v24 }
 0x1a8   :  { %v876_v46 = vpop.f32.mrf.mxu1 }
 0x1a9   :  { %1157 = vst.msk [vmem:[%s2437_s5 + $0x58] sm:$0xff] %vm1145_vm1, %v882_v45  ;;  %v877_v47 = vadd.f32 %v2110_v24, %v876_v46 }
 0x1aa   :  { %v1584_v48 = vpop.f32.mrf.mxu1 }
 0x1ab   :  { %1156 = vst.msk [vmem:[%s2437_s5 + $0x50] sm:$0xff] %vm1145_vm1, %v877_v47  ;;  %v892_v49 = vadd.f32 %v1584_v48, %v2110_v24 }
 0x1ac   :  { %v886_v50 = vpop.f32.mrf.mxu1 }
 0x1ad   :  { %1159 = vst.msk [vmem:[%s2437_s5 + $0x68] sm:$0xff] %vm1145_vm1, %v892_v49  ;;  %v887_v51 = vadd.f32 %v2110_v24, %v886_v50 }
 0x1ae   :  { %v1587_v52 = vpop.f32.mrf.mxu1 }
 0x1af   :  { %1158 = vst.msk [vmem:[%s2437_s5 + $0x60] sm:$0xff] %vm1145_vm1, %v887_v51  ;;  %v902_v53 = vadd.f32 %v1587_v52, %v2110_v24 }
 0x1b0   :  { %v896_v54 = vpop.f32.mrf.mxu1 }
 0x1b1   :  { %1161 = vst.msk [vmem:[%s2437_s5 + $0x78] sm:$0xff] %vm1145_vm1, %v902_v53  ;;  %v897_v55 = vadd.f32 %v2110_v24, %v896_v54 }
 0x1b2   :  { %v1590_v56 = vpop.f32.mrf.mxu1 }
 0x1b3   :  { %1160 = vst.msk [vmem:[%s2437_s5 + $0x70] sm:$0xff] %vm1145_vm1, %v897_v55  ;;  %v912_v57 = vadd.f32 %v1590_v56, %v2110_v24 }
 0x1b4   :  { %v906_v58 = vpop.f32.mrf.mxu1 }
 0x1b5   :  { %1163 = vst.msk [vmem:[%s2437_s5 + $0x88] sm:$0xff] %vm1145_vm1, %v912_v57  ;;  %v907_v59 = vadd.f32 %v2110_v24, %v906_v58 }
 0x1b6   :  { %v1593_v60 = vpop.f32.mrf.mxu1 }
 0x1b7   :  { %1162 = vst.msk [vmem:[%s2437_s5 + $0x80] sm:$0xff] %vm1145_vm1, %v907_v59  ;;  %v922_v61 = vadd.f32 %v1593_v60, %v2110_v24 }
 0x1b8   :  { %v916_v62 = vpop.f32.mrf.mxu1 }
 0x1b9   :  { %1165 = vst.msk [vmem:[%s2437_s5 + $0x98] sm:$0xff] %vm1145_vm1, %v922_v61  ;;  %v917_v63 = vadd.f32 %v2110_v24, %v916_v62 }
 0x1ba   :  { %v1596_v0 = vpop.f32.mrf.mxu1 }
 0x1bb   :  { %1164 = vst.msk [vmem:[%s2437_s5 + $0x90] sm:$0xff] %vm1145_vm1, %v917_v63  ;;  %v932_v1 = vadd.f32 %v1596_v0, %v2110_v24 }
 0x1bc   :  { %v926_v2 = vpop.f32.mrf.mxu1 }
 0x1bd   :  { %1167 = vst.msk [vmem:[%s2437_s5 + $0xa8] sm:$0xff] %vm1145_vm1, %v932_v1  ;;  %v927_v3 = vadd.f32 %v2110_v24, %v926_v2 }
 0x1be   :  { %v1599_v4 = vpop.f32.mrf.mxu1 }
 0x1bf   :  { %1166 = vst.msk [vmem:[%s2437_s5 + $0xa0] sm:$0xff] %vm1145_vm1, %v927_v3  ;;  %v942_v5 = vadd.f32 %v1599_v4, %v2110_v24 }
 0x1c0   :  { %v936_v6 = vpop.f32.mrf.mxu1 }
 0x1c1   :  { %1169 = vst.msk [vmem:[%s2437_s5 + $0xb8] sm:$0xff] %vm1145_vm1, %v942_v5  ;;  %v937_v7 = vadd.f32 %v2110_v24, %v936_v6 }
 0x1c2   :  { %v1602_v8 = vpop.f32.mrf.mxu1 }
 0x1c3   :  { %1168 = vst.msk [vmem:[%s2437_s5 + $0xb0] sm:$0xff] %vm1145_vm1, %v937_v7  ;;  %v952_v9 = vadd.f32 %v1602_v8, %v2110_v24 }
 0x1c4   :  { %v946_v10 = vpop.f32.mrf.mxu1 }
 0x1c5   :  { %1171 = vst.msk [vmem:[%s2437_s5 + $0xc8] sm:$0xff] %vm1145_vm1, %v952_v9  ;;  %v947_v11 = vadd.f32 %v2110_v24, %v946_v10 }
 0x1c6   :  { %v1605_v12 = vpop.f32.mrf.mxu1 }
 0x1c7   :  { %1170 = vst.msk [vmem:[%s2437_s5 + $0xc0] sm:$0xff] %vm1145_vm1, %v947_v11  ;;  %v962_v13 = vadd.f32 %v1605_v12, %v2110_v24 }
 0x1c8   :  { %v956_v14 = vpop.f32.mrf.mxu1 }
 0x1c9   :  { %1173 = vst.msk [vmem:[%s2437_s5 + $0xd8] sm:$0xff] %vm1145_vm1, %v962_v13  ;;  %v957_v15 = vadd.f32 %v2110_v24, %v956_v14 }
 0x1ca   :  { %v1608_v16 = vpop.f32.mrf.mxu1 }
 0x1cb   :  { %1172 = vst.msk [vmem:[%s2437_s5 + $0xd0] sm:$0xff] %vm1145_vm1, %v957_v15  ;;  %v972_v17 = vadd.f32 %v1608_v16, %v2110_v24 }
 0x1cc   :  { %v966_v18 = vpop.f32.mrf.mxu1 }
 0x1cd   :  { %1175 = vst.msk [vmem:[%s2437_s5 + $0xe8] sm:$0xff] %vm1145_vm1, %v972_v17  ;;  %v967_v19 = vadd.f32 %v2110_v24, %v966_v18 }
 0x1ce   :  { %v1611_v21 = vpop.f32.mrf.mxu1 }
 0x1cf   :  { %1174 = vst.msk [vmem:[%s2437_s5 + $0xe0] sm:$0xff] %vm1145_vm1, %v967_v19  ;;  %v982_v22 = vadd.f32 %v1611_v21, %v2110_v24 }
 0x1d0   :  { %v976_v23 = vpop.f32.mrf.mxu1 }
 0x1d1   :  { %1177 = vst.msk [vmem:[%s2437_s5 + $0xf8] sm:$0xff] %vm1145_vm1, %v982_v22  ;;  %v977_v25 = vadd.f32 %v2110_v24, %v976_v23 }
 0x1d2   :  { %v1614_v26 = vpop.f32.mrf.mxu1 }
 0x1d3   :  { %1176 = vst.msk [vmem:[%s2437_s5 + $0xf0] sm:$0xff] %vm1145_vm1, %v977_v25  ;;  %v992_v27 = vadd.f32 %v1614_v26, %v2110_v24 }
 0x1d4   :  { %v986_v20 = vpop.f32.mrf.mxu1 }
 0x1d5   :  { %1179 = vst.msk [vmem:[%s2437_s5 + $0x108] sm:$0xff] %vm1145_vm1, %v992_v27  ;;  %v987_v28 = vadd.f32 %v2110_v24, %v986_v20 }
 0x1d6   :  { %v1617_v29 = vpop.f32.mrf.mxu1 }
 0x1d7   :  { %1178 = vst.msk [vmem:[%s2437_s5 + $0x100] sm:$0xff] %vm1145_vm1, %v987_v28  ;;  %v1002_v30 = vadd.f32 %v1617_v29, %v2110_v24 }
 0x1d8   :  { %v996_v31 = vpop.f32.mrf.mxu1 }
 0x1d9   :  { %1181 = vst.msk [vmem:[%s2437_s5 + $0x118] sm:$0xff] %vm1145_vm1, %v1002_v30  ;;  %v997_v32 = vadd.f32 %v2110_v24, %v996_v31 }
 0x1da   :  { %v1620_v33 = vpop.f32.mrf.mxu1 }
 0x1db   :  { %1180 = vst.msk [vmem:[%s2437_s5 + $0x110] sm:$0xff] %vm1145_vm1, %v997_v32  ;;  %v1012_v34 = vadd.f32 %v1620_v33, %v2110_v24 }
 0x1dc   :  { %v1006_v35 = vpop.f32.mrf.mxu1 }
 0x1dd   :  { %1183 = vst.msk [vmem:[%s2437_s5 + $0x128] sm:$0xff] %vm1145_vm1, %v1012_v34  ;;  %v1007_v36 = vadd.f32 %v2110_v24, %v1006_v35 }
 0x1de   :  { %v1623_v37 = vpop.f32.mrf.mxu1 }
 0x1df   :  { %1182 = vst.msk [vmem:[%s2437_s5 + $0x120] sm:$0xff] %vm1145_vm1, %v1007_v36  ;;  %v1022_v38 = vadd.f32 %v1623_v37, %v2110_v24 }
 0x1e0   :  { %v1016_v39 = vpop.f32.mrf.mxu1 }
 0x1e1   :  { %1185 = vst.msk [vmem:[%s2437_s5 + $0x138] sm:$0xff] %vm1145_vm1, %v1022_v38  ;;  %v1017_v40 = vadd.f32 %v2110_v24, %v1016_v39 }
 0x1e2   :  { %v1626_v41 = vpop.f32.mrf.mxu1 }
 0x1e3   :  { %1184 = vst.msk [vmem:[%s2437_s5 + $0x130] sm:$0xff] %vm1145_vm1, %v1017_v40  ;;  %v1032_v42 = vadd.f32 %v1626_v41, %v2110_v24 }
 0x1e4   :  { %v1026_v43 = vpop.f32.mrf.mxu1 }
 0x1e5   :  { %1187 = vst.msk [vmem:[%s2437_s5 + $0x148] sm:$0xff] %vm1145_vm1, %v1032_v42  ;;  %v1027_v44 = vadd.f32 %v2110_v24, %v1026_v43 }
 0x1e6   :  { %v1629_v45 = vpop.f32.mrf.mxu1 }
 0x1e7   :  { %1186 = vst.msk [vmem:[%s2437_s5 + $0x140] sm:$0xff] %vm1145_vm1, %v1027_v44  ;;  %v1042_v46 = vadd.f32 %v1629_v45, %v2110_v24 }
 0x1e8   :  { %v1036_v47 = vpop.f32.mrf.mxu1 }
 0x1e9   :  { %1189 = vst.msk [vmem:[%s2437_s5 + $0x158] sm:$0xff] %vm1145_vm1, %v1042_v46  ;;  %v1037_v48 = vadd.f32 %v2110_v24, %v1036_v47 }
 0x1ea   :  { %v1632_v49 = vpop.f32.mrf.mxu1 }
 0x1eb   :  { %1188 = vst.msk [vmem:[%s2437_s5 + $0x150] sm:$0xff] %vm1145_vm1, %v1037_v48  ;;  %v1052_v50 = vadd.f32 %v1632_v49, %v2110_v24 }
 0x1ec   :  { %v1046_v51 = vpop.f32.mrf.mxu1 }
 0x1ed   :  { %1191 = vst.msk [vmem:[%s2437_s5 + $0x168] sm:$0xff] %vm1145_vm1, %v1052_v50  ;;  %v1047_v52 = vadd.f32 %v2110_v24, %v1046_v51 }
 0x1ee   :  { %v1635_v53 = vpop.f32.mrf.mxu1 }
 0x1ef   :  { %1190 = vst.msk [vmem:[%s2437_s5 + $0x160] sm:$0xff] %vm1145_vm1, %v1047_v52  ;;  %v1062_v54 = vadd.f32 %v1635_v53, %v2110_v24 }
 0x1f0   :  { %v1056_v55 = vpop.f32.mrf.mxu1 }
 0x1f1   :  { %1193 = vst.msk [vmem:[%s2437_s5 + $0x178] sm:$0xff] %vm1145_vm1, %v1062_v54  ;;  %v1057_v56 = vadd.f32 %v2110_v24, %v1056_v55 }
 0x1f2   :  { %v1638_v57 = vpop.f32.mrf.mxu1 }
 0x1f3   :  { %1192 = vst.msk [vmem:[%s2437_s5 + $0x170] sm:$0xff] %vm1145_vm1, %v1057_v56  ;;  %v1072_v58 = vadd.f32 %v1638_v57, %v2110_v24 }
 0x1f4   :  { %v1066_v59 = vpop.f32.mrf.mxu1 }
 0x1f5   :  { %1195 = vst.msk [vmem:[%s2437_s5 + $0x188] sm:$0xff] %vm1145_vm1, %v1072_v58  ;;  %v1067_v60 = vadd.f32 %v2110_v24, %v1066_v59 }
 0x1f6   :  { %v1641_v61 = vpop.f32.mrf.mxu1 }
 0x1f7   :  { %1194 = vst.msk [vmem:[%s2437_s5 + $0x180] sm:$0xff] %vm1145_vm1, %v1067_v60  ;;  %v1082_v62 = vadd.f32 %v1641_v61, %v2110_v24 }
 0x1f8   :  { %v1076_v63 = vpop.f32.mrf.mxu1 }
 0x1f9   :  { %1197 = vst.msk [vmem:[%s2437_s5 + $0x198] sm:$0xff] %vm1145_vm1, %v1082_v62  ;;  %v1077_v0 = vadd.f32 %v2110_v24, %v1076_v63 }
 0x1fa   :  { %v1644_v1 = vpop.f32.mrf.mxu1 }
 0x1fb   :  { %1196 = vst.msk [vmem:[%s2437_s5 + $0x190] sm:$0xff] %vm1145_vm1, %v1077_v0  ;;  %v1092_v2 = vadd.f32 %v1644_v1, %v2110_v24 }
 0x1fc   :  { %v1086_v3 = vpop.f32.mrf.mxu1 }
 0x1fd   :  { %1199 = vst.msk [vmem:[%s2437_s5 + $0x1a8] sm:$0xff] %vm1145_vm1, %v1092_v2  ;;  %v1087_v4 = vadd.f32 %v2110_v24, %v1086_v3 }
 0x1fe   :  { %v1647_v5 = vpop.f32.mrf.mxu1 }
 0x1ff   :  { %1198 = vst.msk [vmem:[%s2437_s5 + $0x1a0] sm:$0xff] %vm1145_vm1, %v1087_v4  ;;  %v1102_v6 = vadd.f32 %v1647_v5, %v2110_v24 }
 0x200   :  { %v1096_v7 = vpop.f32.mrf.mxu1 }
 0x201   :  { %1201 = vst.msk [vmem:[%s2437_s5 + $0x1b8] sm:$0xff] %vm1145_vm1, %v1102_v6  ;;  %v1097_v8 = vadd.f32 %v2110_v24, %v1096_v7 }
 0x202   :  { %v1650_v9 = vpop.f32.mrf.mxu1 }
 0x203   :  { %1200 = vst.msk [vmem:[%s2437_s5 + $0x1b0] sm:$0xff] %vm1145_vm1, %v1097_v8  ;;  %v1112_v10 = vadd.f32 %v1650_v9, %v2110_v24 }
 0x204   :  { %v1106_v11 = vpop.f32.mrf.mxu1 }
 0x205   :  { %1203 = vst.msk [vmem:[%s2437_s5 + $0x1c8] sm:$0xff] %vm1145_vm1, %v1112_v10  ;;  %v1107_v12 = vadd.f32 %v2110_v24, %v1106_v11 }
 0x206   :  { %v1653_v13 = vpop.f32.mrf.mxu1 }
 0x207   :  { %1202 = vst.msk [vmem:[%s2437_s5 + $0x1c0] sm:$0xff] %vm1145_vm1, %v1107_v12  ;;  %v1122_v14 = vadd.f32 %v1653_v13, %v2110_v24 }
 0x208   :  { %v1116_v15 = vpop.f32.mrf.mxu1 }
 0x209   :  { %1205 = vst.msk [vmem:[%s2437_s5 + $0x1d8] sm:$0xff] %vm1145_vm1, %v1122_v14  ;;  %v1117_v16 = vadd.f32 %v2110_v24, %v1116_v15 }
 0x20a   :  { %v1656_v17 = vpop.f32.mrf.mxu1 }
 0x20b   :  { %1204 = vst.msk [vmem:[%s2437_s5 + $0x1d0] sm:$0xff] %vm1145_vm1, %v1117_v16  ;;  %v1132_v18 = vadd.f32 %v1656_v17, %v2110_v24 }
 0x20c   :  { %v1126_v19 = vpop.f32.mrf.mxu1 }
 0x20d   :  { %1207 = vst.msk [vmem:[%s2437_s5 + $0x1e8] sm:$0xff] %vm1145_vm1, %v1132_v18  ;;  %v1127_v21 = vadd.f32 %v2110_v24, %v1126_v19 }
 0x20e   :  { %v1659_v22 = vpop.f32.mrf.mxu1 }
 0x20f   :  { %1206 = vst.msk [vmem:[%s2437_s5 + $0x1e0] sm:$0xff] %vm1145_vm1, %v1127_v21  ;;  %v1142_v23 = vadd.f32 %v1659_v22, %v2110_v24 }
 0x210   :  { %v1136_v25 = vpop.f32.mrf.mxu1 }
 0x211   :  { %1209 = vst.msk [vmem:[%s2437_s5 + $0x1f8] sm:$0xff] %vm1145_vm1, %v1142_v23  ;;  %v1137_v26 = vadd.f32 %v2110_v24, %v1136_v25 }
 0x213   :  { %1208 = vst.msk [vmem:[%s2437_s5 + $0x1f0] sm:$0xff] %vm1145_vm1, %v1137_v26 }

</bundles_post_ra>
